<compile_context>
chip_gen: v7x
topology: tpu7x:2x2x1
jax: 0.10.0
libtpu: 0.0.40
codegen_flags: <defaults>
</compile_context>

<pallas_src>
import jax
import jax.numpy as jnp
from jax.experimental import pallas as pl
from jax.experimental.pallas import tpu as pltpu


def _round_up(x, m):
    return (x + m - 1) // m * m


def _make_rnn_block_kernel(T, t_blk):
    """Builds the per-time-block kernel (t_blk timesteps per grid step)."""
    needs_mask = (T % t_blk) != 0          # last block has padded timesteps
    last_block = (T - 1) // t_blk          # block holding the last valid step
    last_local = (T - 1) % t_blk           # its local index inside the block

    def kernel(x_ref, h0_ref, wx_ref, wh_ref, b_ref, out_ref, hout_ref,
               p_ref, h_ref):
        """One grid step == one block of t_blk characters.

        x_ref   : (t_blk*Bp, Ip)   bf16  one-hot block (time-major, padded)
        h0_ref  : (Bp, Hp)         bf16  initial hidden (resident)
        wx_ref  : (Ip, Hp+Op)      bf16  [Wxh | Wxo]^T  (resident)
        wh_ref  : (Hp, Hp+Op)      bf16  [Whh | Who]^T  (resident)
        b_ref   : (1, Hp+Op)       f32   [bh | bo, pad logit lanes = -1e30]
        out_ref : (t_blk*Bp, Op)   f32   per-step log_softmax outputs
        hout_ref: (Bp, Hp)         f32   final hidden (written once)
        p_ref   : (t_blk*Bp, Hp+Op) f32  VMEM scratch: hoisted projection
        h_ref   : (Bp, Hp)         bf16  VMEM scratch: recurrent carry
        """
        blk = pl.program_id(0)
        Bp, Hp = h_ref.shape

        # ---- carry init (explicit scratch carry, not output-revisit) ----
        @pl.when(blk == 0)
        def _init():
            h_ref[...] = h0_ref[...]

        # ---- prologue: hoisted input projection for the whole block -----
        # One MXU pass off the serial h-chain; padded logit lanes pick up
        # the -1e30 bias here.
        p_ref[...] = (jnp.dot(x_ref[...], wx_ref[...],
                              preferred_element_type=jnp.float32)
                      + b_ref[...])

        # ---- serial recurrence: only h @ Wh sits on the critical path ----
        for t in range(t_blk):                       # static unroll (small)
            rows = pl.ds(t * Bp, Bp)                 # static offset
            rec = jnp.dot(h_ref[...], wh_ref[...],
                          preferred_element_type=jnp.float32)
            slab = p_ref[rows, :] + rec              # (Bp, Hp+Op) f32
            h_new = slab[:, :Hp]                     # f32 new hidden
            out_ref[rows, :] = slab[:, Hp:]          # raw logits; epilogue later

            if needs_mask:
                # Don't let padded timesteps corrupt the hidden state.
                @pl.when(blk * t_blk + t < T)
                def _upd(h_new=h_new):
                    h_ref[...] = h_new.astype(h_ref.dtype)
            else:
                h_ref[...] = h_new.astype(h_ref.dtype)

            if t == last_local:
                # Final hidden written once, in f32, at the last valid step.
                @pl.when(blk == last_block)
                def _final(h_new=h_new):
                    hout_ref[...] = h_new

        # ---- epilogue: one vectorized log_softmax over the whole block ---
        logits = out_ref[...]                        # (t_blk*Bp, Op) f32
        m = jnp.max(logits, axis=-1, keepdims=True)
        shifted = logits - m
        lse = jnp.log(jnp.sum(jnp.exp(shifted), axis=-1, keepdims=True))
        out_ref[...] = shifted - lse

    return kernel


def rnn_forward_sequence(xs, h0, w_i2h, b_i2h, w_i2o, b_i2o, *, t_blk=8):
    """Runs the RNN over a whole sequence in one pallas_call.

    xs: (T, B, I) f32, h0: (B, H) f32,
    w_i2h: (H, I+H), b_i2h: (H,), w_i2o: (O, I+H), b_i2o: (O,).
    Returns (log-prob outputs (T, B, O), final hidden (B, H)).
    """
    T, B, I = xs.shape
    H = h0.shape[1]
    O = w_i2o.shape[0]

    t_blk = int(min(t_blk, T))
    nblk = -(-T // t_blk)
    T_pad = nblk * t_blk

    Bp = _round_up(max(B, 8), 8)          # sublane-dense batch
    Ip = _round_up(I, 128)                # lane-dense input
    Hp = _round_up(H, 128)                # lane-dense hidden
    Op = _round_up(O, 128)                # lane-dense logits (unmasked stores)
    HOp = Hp + Op

    # ---- weight prep (glue; executed once per call) ----
    wx = jnp.zeros((Ip, HOp), jnp.float32)
    wx = (wx.at[:I, :H].set(w_i2h[:, :I].T)
             .at[:I, Hp:Hp + O].set(w_i2o[:, :I].T))
    wh = jnp.zeros((Hp, HOp), jnp.float32)
    wh = (wh.at[:H, :H].set(w_i2h[:, I:].T)
             .at[:H, Hp:Hp + O].set(w_i2o[:, I:].T))
    # Padded logit lanes get a huge negative bias so they never win the max
    # and their exp() is exactly 0 in the log_softmax reduction.
    bias = jnp.zeros((1, HOp), jnp.float32)
    bias = (bias.at[0, :H].set(b_i2h)
                 .at[0, Hp:Hp + O].set(b_i2o)
                 .at[0, Hp + O:].set(-1e30))

    xs_p = jnp.zeros((T_pad, Bp, Ip), jnp.float32).at[:T, :B, :I].set(xs)
    h0_p = jnp.zeros((Bp, Hp), jnp.float32).at[:B, :H].set(h0)

    # bf16 MXU operands (halves weight/input DMA; f32 accumulate in-kernel).
    xs2 = xs_p.astype(jnp.bfloat16).reshape(T_pad * Bp, Ip)   # time-major 2-D
    h0_p = h0_p.astype(jnp.bfloat16)
    wx = wx.astype(jnp.bfloat16)
    wh = wh.astype(jnp.bfloat16)

    kernel = _make_rnn_block_kernel(T, t_blk)

    outs2, h_final_p = pl.pallas_call(
        kernel,
        out_shape=(jax.ShapeDtypeStruct((T_pad * Bp, Op), jnp.float32),
                   jax.ShapeDtypeStruct((Bp, Hp), jnp.float32)),
        grid=(nblk,),
        in_specs=(
            pl.BlockSpec((t_blk * Bp, Ip), lambda b: (b, 0)),   # x block
            pl.BlockSpec((Bp, Hp), lambda b: (0, 0)),           # h0 (resident)
            pl.BlockSpec((Ip, HOp), lambda b: (0, 0)),          # Wx (resident)
            pl.BlockSpec((Hp, HOp), lambda b: (0, 0)),          # Wh (resident)
            pl.BlockSpec((1, HOp), lambda b: (0, 0)),           # bias (resident)
        ),
        out_specs=(
            pl.BlockSpec((t_blk * Bp, Op), lambda b: (b, 0)),   # log-probs
            pl.BlockSpec((Bp, Hp), lambda b: (0, 0)),           # final hidden
        ),
        scratch_shapes=[
            pltpu.VMEM((t_blk * Bp, HOp), jnp.float32),  # hoisted projection
            pltpu.VMEM((Bp, Hp), jnp.bfloat16),          # recurrent carry
        ],
        compiler_params=pltpu.CompilerParams(
            dimension_semantics=("arbitrary",)),   # recurrence => sequential
    )(xs2, h0_p, wx, wh, bias)

    outs = outs2.reshape(T_pad, Bp, Op)[:T, :B, :O]
    return outs, h_final_p[:B, :H]


def reference_forward_sequence(xs, h0, w_i2h, b_i2h, w_i2o, b_i2o):
    """Pure-JAX f32 reference: loop the PyTorch module semantics over T."""
    T = xs.shape[0]
    h = h0
    outs = []
    for t in range(T):
        combined = jnp.concatenate([xs[t], h], axis=1)
        h = combined @ w_i2h.T + b_i2h
        logits = combined @ w_i2o.T + b_i2o
        outs.append(jax.nn.log_softmax(logits, axis=1))
    return jnp.stack(outs, axis=0), h


if __name__ == "__main__":
    # Shapes implied by the module: input_size = n_letters = 57, hidden = 128.
    # Small output size (18 name categories), batch = 2, sequence length = 8.
    n_letters = 57
    n_hidden = 128
    n_output = 18
    batch = 2
    seq_len = 8

    key = jax.random.PRNGKey(0)
    k1, k2, k3, k4, k5 = jax.random.split(key, 5)

    in_feat = n_letters + n_hidden
    bound = 1.0 / jnp.sqrt(jnp.float32(in_feat))
    w_i2h = jax.random.uniform(k1, (n_hidden, in_feat), jnp.float32, -bound, bound)
    b_i2h = jax.random.uniform(k2, (n_hidden,), jnp.float32, -bound, bound)
    w_i2o = jax.random.uniform(k3, (n_output, in_feat), jnp.float32, -bound, bound)
    b_i2o = jax.random.uniform(k4, (n_output,), jnp.float32, -bound, bound)

    # One-hot "letter" inputs per timestep (like lineToTensor) + zero hidden.
    idx = jax.random.randint(k5, (seq_len, batch), 0, n_letters)
    xs = jax.nn.one_hot(idx, n_letters, dtype=jnp.float32)        # (T, B, 57)
    h0 = jnp.zeros((batch, n_hidden), jnp.float32)                # (B, 128)

    ref_outs, ref_h = reference_forward_sequence(xs, h0, w_i2h, b_i2h,
                                                 w_i2o, b_i2o)

    fwd = jax.jit(rnn_forward_sequence, static_argnames=("t_blk",))

    # Default: whole sequence in a single time block (grid=(1,)).
    outs, h_final = fwd(xs, h0, w_i2h, b_i2h, w_i2o, b_i2o)
    outs = jax.block_until_ready(outs)
    h_final = jax.block_until_ready(h_final)

    assert outs.shape == (seq_len, batch, n_output)
    assert h_final.shape == (batch, n_hidden)
    # bf16 MXU operands / bf16 carry with f32 accumulate -> small quantization
    # error vs the pure-f32 reference over 8 recurrent steps.
    assert jnp.allclose(outs, ref_outs, atol=3e-2, rtol=3e-2)
    assert jnp.allclose(h_final, ref_h, atol=3e-2, rtol=3e-2)
    assert jnp.all(jnp.isfinite(outs)) and jnp.all(jnp.isfinite(h_final))

    # Also exercise the multi-block + masked-tail path (T=8, t_blk=3 -> grid 3,
    # last block has one padded timestep that must not corrupt the carry).
    outs2, h_final2 = fwd(xs, h0, w_i2h, b_i2h, w_i2o, b_i2o, t_blk=3)
    outs2 = jax.block_until_ready(outs2)
    h_final2 = jax.block_until_ready(h_final2)
    assert jnp.allclose(outs2, ref_outs, atol=3e-2, rtol=3e-2)
    assert jnp.allclose(h_final2, ref_h, atol=3e-2, rtol=3e-2)

    print("KERNEL_OK")
</pallas_src>

<mosaic_0001>
module attributes {stable_mosaic.version = 11 : i64} {
  func.func @kernel(%arg0: i32, %arg1: memref<64x128xbf16, #tpu.memory_space<vmem>>, %arg2: memref<8x128xbf16, #tpu.memory_space<vmem>>, %arg3: memref<128x256xbf16, #tpu.memory_space<vmem>>, %arg4: memref<128x256xbf16, #tpu.memory_space<vmem>>, %arg5: memref<1x256xf32, #tpu.memory_space<vmem>>, %arg6: memref<64x128xf32, #tpu.memory_space<vmem>>, %arg7: memref<8x128xf32, #tpu.memory_space<vmem>>, %arg8: memref<64x256xf32, #tpu.memory_space<vmem>>, %arg9: memref<8x128xbf16, #tpu.memory_space<vmem>>) attributes {dimension_semantics = [#tpu.dimension_semantics<arbitrary>], iteration_bounds = array<i64: 1>, scalar_prefetch = 0 : i64, scratch_operands = 2 : i64, tpu.core_type = #tpu.core_type<tc>, window_params = [{transform_indices = @transform_0, window_bounds = array<i64: 64, 128>}, {pipeline_mode = #tpu.pipeline_mode<synchronous>, transform_indices = @transform_1, window_bounds = array<i64: 8, 128>}, {pipeline_mode = #tpu.pipeline_mode<synchronous>, transform_indices = @transform_2, window_bounds = array<i64: 128, 256>}, {pipeline_mode = #tpu.pipeline_mode<synchronous>, transform_indices = @transform_3, window_bounds = array<i64: 128, 256>}, {pipeline_mode = #tpu.pipeline_mode<synchronous>, transform_indices = @transform_4, window_bounds = array<i64: 1, 256>}, {transform_indices = @transform_5, window_bounds = array<i64: 64, 128>}, {pipeline_mode = #tpu.pipeline_mode<synchronous>, transform_indices = @transform_6, window_bounds = array<i64: 8, 128>}]} {
    %c0_i32 = arith.constant 0 : i32
    %0 = arith.cmpi eq, %arg0, %c0_i32 : i32
    %1 = arith.extui %0 : i1 to i32
    %c0_i32_0 = arith.constant 0 : i32
    %2 = arith.cmpi ne, %1, %c0_i32_0 : i32
    scf.if %2 {
      %c0_97 = arith.constant 0 : index
      %c0_98 = arith.constant 0 : index
      %105 = vector.load %arg2[%c0_97, %c0_98] : memref<8x128xbf16, #tpu.memory_space<vmem>>, vector<8x128xbf16>
      %c0_99 = arith.constant 0 : index
      %c0_100 = arith.constant 0 : index
      %106 = vector.load %arg9[%c0_99, %c0_100] : memref<8x128xbf16, #tpu.memory_space<vmem>>, vector<8x128xbf16>
      tpu.vector_store %arg9[%c0_99, %c0_100], %105 {strides = array<i32>} : memref<8x128xbf16, #tpu.memory_space<vmem>>, vector<8x128xbf16>,
    } else {
    }
    %c0 = arith.constant 0 : index
    %c0_1 = arith.constant 0 : index
    %3 = vector.load %arg1[%c0, %c0_1] : memref<64x128xbf16, #tpu.memory_space<vmem>>, vector<64x128xbf16>
    %c0_2 = arith.constant 0 : index
    %c0_3 = arith.constant 0 : index
    %4 = vector.load %arg3[%c0_2, %c0_3] : memref<128x256xbf16, #tpu.memory_space<vmem>>, vector<128x256xbf16>
    %cst = arith.constant dense<0.000000e+00> : vector<64x256xf32>
    %5 = tpu.matmul %3, %4, %cst {dimension_numbers = #tpu.dot_dimension_numbers<[1], [0], [0], [1], [0, 0, 1, 1], [], []>} : vector<64x128xbf16>, vector<128x256xbf16>, vector<64x256xf32> -> vector<64x256xf32>
    %c0_4 = arith.constant 0 : index
    %c0_5 = arith.constant 0 : index
    %6 = vector.load %arg5[%c0_4, %c0_5] : memref<1x256xf32, #tpu.memory_space<vmem>>, vector<1x256xf32>
    %7 = vector.broadcast %6 : vector<1x256xf32> to vector<64x256xf32>
    %8 = arith.addf %5, %7 : vector<64x256xf32>
    %c0_6 = arith.constant 0 : index
    %c0_7 = arith.constant 0 : index
    %9 = vector.load %arg8[%c0_6, %c0_7] : memref<64x256xf32, #tpu.memory_space<vmem>>, vector<64x256xf32>
    tpu.vector_store %arg8[%c0_6, %c0_7], %8 {strides = array<i32>} : memref<64x256xf32, #tpu.memory_space<vmem>>, vector<64x256xf32>,
    %c0_8 = arith.constant 0 : index
    %c0_9 = arith.constant 0 : index
    %10 = vector.load %arg9[%c0_8, %c0_9] : memref<8x128xbf16, #tpu.memory_space<vmem>>, vector<8x128xbf16>
    %c0_10 = arith.constant 0 : index
    %c0_11 = arith.constant 0 : index
    %11 = vector.load %arg4[%c0_10, %c0_11] : memref<128x256xbf16, #tpu.memory_space<vmem>>, vector<128x256xbf16>
    %cst_12 = arith.constant dense<0.000000e+00> : vector<8x256xf32>
    %12 = tpu.matmul %10, %11, %cst_12 {dimension_numbers = #tpu.dot_dimension_numbers<[1], [0], [0], [1], [0, 0, 1, 1], [], []>} : vector<8x128xbf16>, vector<128x256xbf16>, vector<8x256xf32> -> vector<8x256xf32>
    %c0_13 = arith.constant 0 : index
    %c0_14 = arith.constant 0 : index
    %13 = vector.load %arg8[%c0_13, %c0_14] : memref<64x256xf32, #tpu.memory_space<vmem>>, vector<8x256xf32>
    %14 = arith.addf %13, %12 : vector<8x256xf32>
    %15 = vector.extract_strided_slice %14 {offsets = [0, 0], sizes = [8, 128], strides = [1, 1]} : vector<8x256xf32> to vector<8x128xf32>
    %16 = vector.extract_strided_slice %14 {offsets = [0, 128], sizes = [8, 128], strides = [1, 1]} : vector<8x256xf32> to vector<8x128xf32>
    %c0_15 = arith.constant 0 : index
    %c0_16 = arith.constant 0 : index
    %17 = vector.load %arg6[%c0_15, %c0_16] : memref<64x128xf32, #tpu.memory_space<vmem>>, vector<8x128xf32>
    tpu.vector_store %arg6[%c0_15, %c0_16], %16 {strides = array<i32>} : memref<64x128xf32, #tpu.memory_space<vmem>>, vector<8x128xf32>,
    %18 = arith.truncf %15 : vector<8x128xf32> to vector<8x128xbf16>
    %c0_17 = arith.constant 0 : index
    %c0_18 = arith.constant 0 : index
    %19 = vector.load %arg9[%c0_17, %c0_18] : memref<8x128xbf16, #tpu.memory_space<vmem>>, vector<8x128xbf16>
    tpu.vector_store %arg9[%c0_17, %c0_18], %18 {strides = array<i32>} : memref<8x128xbf16, #tpu.memory_space<vmem>>, vector<8x128xbf16>,
    %c0_19 = arith.constant 0 : index
    %c0_20 = arith.constant 0 : index
    %20 = vector.load %arg9[%c0_19, %c0_20] : memref<8x128xbf16, #tpu.memory_space<vmem>>, vector<8x128xbf16>
    %c0_21 = arith.constant 0 : index
    %c0_22 = arith.constant 0 : index
    %21 = vector.load %arg4[%c0_21, %c0_22] : memref<128x256xbf16, #tpu.memory_space<vmem>>, vector<128x256xbf16>
    %cst_23 = arith.constant dense<0.000000e+00> : vector<8x256xf32>
    %22 = tpu.matmul %20, %21, %cst_23 {dimension_numbers = #tpu.dot_dimension_numbers<[1], [0], [0], [1], [0, 0, 1, 1], [], []>} : vector<8x128xbf16>, vector<128x256xbf16>, vector<8x256xf32> -> vector<8x256xf32>
    %c8 = arith.constant 8 : index
    %c0_24 = arith.constant 0 : index
    %23 = vector.load %arg8[%c8, %c0_24] : memref<64x256xf32, #tpu.memory_space<vmem>>, vector<8x256xf32>
    %24 = arith.addf %23, %22 : vector<8x256xf32>
    %25 = vector.extract_strided_slice %24 {offsets = [0, 0], sizes = [8, 128], strides = [1, 1]} : vector<8x256xf32> to vector<8x128xf32>
    %26 = vector.extract_strided_slice %24 {offsets = [0, 128], sizes = [8, 128], strides = [1, 1]} : vector<8x256xf32> to vector<8x128xf32>
    %c8_25 = arith.constant 8 : index
    %c0_26 = arith.constant 0 : index
    %27 = vector.load %arg6[%c8_25, %c0_26] : memref<64x128xf32, #tpu.memory_space<vmem>>, vector<8x128xf32>
    tpu.vector_store %arg6[%c8_25, %c0_26], %26 {strides = array<i32>} : memref<64x128xf32, #tpu.memory_space<vmem>>, vector<8x128xf32>,
    %28 = arith.truncf %25 : vector<8x128xf32> to vector<8x128xbf16>
    %c0_27 = arith.constant 0 : index
    %c0_28 = arith.constant 0 : index
    %29 = vector.load %arg9[%c0_27, %c0_28] : memref<8x128xbf16, #tpu.memory_space<vmem>>, vector<8x128xbf16>
    tpu.vector_store %arg9[%c0_27, %c0_28], %28 {strides = array<i32>} : memref<8x128xbf16, #tpu.memory_space<vmem>>, vector<8x128xbf16>,
    %c0_29 = arith.constant 0 : index
    %c0_30 = arith.constant 0 : index
    %30 = vector.load %arg9[%c0_29, %c0_30] : memref<8x128xbf16, #tpu.memory_space<vmem>>, vector<8x128xbf16>
    %c0_31 = arith.constant 0 : index
    %c0_32 = arith.constant 0 : index
    %31 = vector.load %arg4[%c0_31, %c0_32] : memref<128x256xbf16, #tpu.memory_space<vmem>>, vector<128x256xbf16>
    %cst_33 = arith.constant dense<0.000000e+00> : vector<8x256xf32>
    %32 = tpu.matmul %30, %31, %cst_33 {dimension_numbers = #tpu.dot_dimension_numbers<[1], [0], [0], [1], [0, 0, 1, 1], [], []>} : vector<8x128xbf16>, vector<128x256xbf16>, vector<8x256xf32> -> vector<8x256xf32>
    %c16 = arith.constant 16 : index
    %c0_34 = arith.constant 0 : index
    %33 = vector.load %arg8[%c16, %c0_34] : memref<64x256xf32, #tpu.memory_space<vmem>>, vector<8x256xf32>
    %34 = arith.addf %33, %32 : vector<8x256xf32>
    %35 = vector.extract_strided_slice %34 {offsets = [0, 0], sizes = [8, 128], strides = [1, 1]} : vector<8x256xf32> to vector<8x128xf32>
    %36 = vector.extract_strided_slice %34 {offsets = [0, 128], sizes = [8, 128], strides = [1, 1]} : vector<8x256xf32> to vector<8x128xf32>
    %c16_35 = arith.constant 16 : index
    %c0_36 = arith.constant 0 : index
    %37 = vector.load %arg6[%c16_35, %c0_36] : memref<64x128xf32, #tpu.memory_space<vmem>>, vector<8x128xf32>
    tpu.vector_store %arg6[%c16_35, %c0_36], %36 {strides = array<i32>} : memref<64x128xf32, #tpu.memory_space<vmem>>, vector<8x128xf32>,
    %38 = arith.truncf %35 : vector<8x128xf32> to vector<8x128xbf16>
    %c0_37 = arith.constant 0 : index
    %c0_38 = arith.constant 0 : index
    %39 = vector.load %arg9[%c0_37, %c0_38] : memref<8x128xbf16, #tpu.memory_space<vmem>>, vector<8x128xbf16>
    tpu.vector_store %arg9[%c0_37, %c0_38], %38 {strides = array<i32>} : memref<8x128xbf16, #tpu.memory_space<vmem>>, vector<8x128xbf16>,
    %c0_39 = arith.constant 0 : index
    %c0_40 = arith.constant 0 : index
    %40 = vector.load %arg9[%c0_39, %c0_40] : memref<8x128xbf16, #tpu.memory_space<vmem>>, vector<8x128xbf16>
    %c0_41 = arith.constant 0 : index
    %c0_42 = arith.constant 0 : index
    %41 = vector.load %arg4[%c0_41, %c0_42] : memref<128x256xbf16, #tpu.memory_space<vmem>>, vector<128x256xbf16>
    %cst_43 = arith.constant dense<0.000000e+00> : vector<8x256xf32>
    %42 = tpu.matmul %40, %41, %cst_43 {dimension_numbers = #tpu.dot_dimension_numbers<[1], [0], [0], [1], [0, 0, 1, 1], [], []>} : vector<8x128xbf16>, vector<128x256xbf16>, vector<8x256xf32> -> vector<8x256xf32>
    %c24 = arith.constant 24 : index
    %c0_44 = arith.constant 0 : index
    %43 = vector.load %arg8[%c24, %c0_44] : memref<64x256xf32, #tpu.memory_space<vmem>>, vector<8x256xf32>
    %44 = arith.addf %43, %42 : vector<8x256xf32>
    %45 = vector.extract_strided_slice %44 {offsets = [0, 0], sizes = [8, 128], strides = [1, 1]} : vector<8x256xf32> to vector<8x128xf32>
    %46 = vector.extract_strided_slice %44 {offsets = [0, 128], sizes = [8, 128], strides = [1, 1]} : vector<8x256xf32> to vector<8x128xf32>
    %c24_45 = arith.constant 24 : index
    %c0_46 = arith.constant 0 : index
    %47 = vector.load %arg6[%c24_45, %c0_46] : memref<64x128xf32, #tpu.memory_space<vmem>>, vector<8x128xf32>
    tpu.vector_store %arg6[%c24_45, %c0_46], %46 {strides = array<i32>} : memref<64x128xf32, #tpu.memory_space<vmem>>, vector<8x128xf32>,
    %48 = arith.truncf %45 : vector<8x128xf32> to vector<8x128xbf16>
    %c0_47 = arith.constant 0 : index
    %c0_48 = arith.constant 0 : index
    %49 = vector.load %arg9[%c0_47, %c0_48] : memref<8x128xbf16, #tpu.memory_space<vmem>>, vector<8x128xbf16>
    tpu.vector_store %arg9[%c0_47, %c0_48], %48 {strides = array<i32>} : memref<8x128xbf16, #tpu.memory_space<vmem>>, vector<8x128xbf16>,
    %c0_49 = arith.constant 0 : index
    %c0_50 = arith.constant 0 : index
    %50 = vector.load %arg9[%c0_49, %c0_50] : memref<8x128xbf16, #tpu.memory_space<vmem>>, vector<8x128xbf16>
    %c0_51 = arith.constant 0 : index
    %c0_52 = arith.constant 0 : index
    %51 = vector.load %arg4[%c0_51, %c0_52] : memref<128x256xbf16, #tpu.memory_space<vmem>>, vector<128x256xbf16>
    %cst_53 = arith.constant dense<0.000000e+00> : vector<8x256xf32>
    %52 = tpu.matmul %50, %51, %cst_53 {dimension_numbers = #tpu.dot_dimension_numbers<[1], [0], [0], [1], [0, 0, 1, 1], [], []>} : vector<8x128xbf16>, vector<128x256xbf16>, vector<8x256xf32> -> vector<8x256xf32>
    %c32 = arith.constant 32 : index
    %c0_54 = arith.constant 0 : index
    %53 = vector.load %arg8[%c32, %c0_54] : memref<64x256xf32, #tpu.memory_space<vmem>>, vector<8x256xf32>
    %54 = arith.addf %53, %52 : vector<8x256xf32>
    %55 = vector.extract_strided_slice %54 {offsets = [0, 0], sizes = [8, 128], strides = [1, 1]} : vector<8x256xf32> to vector<8x128xf32>
    %56 = vector.extract_strided_slice %54 {offsets = [0, 128], sizes = [8, 128], strides = [1, 1]} : vector<8x256xf32> to vector<8x128xf32>
    %c32_55 = arith.constant 32 : index
    %c0_56 = arith.constant 0 : index
    %57 = vector.load %arg6[%c32_55, %c0_56] : memref<64x128xf32, #tpu.memory_space<vmem>>, vector<8x128xf32>
    tpu.vector_store %arg6[%c32_55, %c0_56], %56 {strides = array<i32>} : memref<64x128xf32, #tpu.memory_space<vmem>>, vector<8x128xf32>,
    %58 = arith.truncf %55 : vector<8x128xf32> to vector<8x128xbf16>
    %c0_57 = arith.constant 0 : index
    %c0_58 = arith.constant 0 : index
    %59 = vector.load %arg9[%c0_57, %c0_58] : memref<8x128xbf16, #tpu.memory_space<vmem>>, vector<8x128xbf16>
    tpu.vector_store %arg9[%c0_57, %c0_58], %58 {strides = array<i32>} : memref<8x128xbf16, #tpu.memory_space<vmem>>, vector<8x128xbf16>,
    %c0_59 = arith.constant 0 : index
    %c0_60 = arith.constant 0 : index
    %60 = vector.load %arg9[%c0_59, %c0_60] : memref<8x128xbf16, #tpu.memory_space<vmem>>, vector<8x128xbf16>
    %c0_61 = arith.constant 0 : index
    %c0_62 = arith.constant 0 : index
    %61 = vector.load %arg4[%c0_61, %c0_62] : memref<128x256xbf16, #tpu.memory_space<vmem>>, vector<128x256xbf16>
    %cst_63 = arith.constant dense<0.000000e+00> : vector<8x256xf32>
    %62 = tpu.matmul %60, %61, %cst_63 {dimension_numbers = #tpu.dot_dimension_numbers<[1], [0], [0], [1], [0, 0, 1, 1], [], []>} : vector<8x128xbf16>, vector<128x256xbf16>, vector<8x256xf32> -> vector<8x256xf32>
    %c40 = arith.constant 40 : index
    %c0_64 = arith.constant 0 : index
    %63 = vector.load %arg8[%c40, %c0_64] : memref<64x256xf32, #tpu.memory_space<vmem>>, vector<8x256xf32>
    %64 = arith.addf %63, %62 : vector<8x256xf32>
    %65 = vector.extract_strided_slice %64 {offsets = [0, 0], sizes = [8, 128], strides = [1, 1]} : vector<8x256xf32> to vector<8x128xf32>
    %66 = vector.extract_strided_slice %64 {offsets = [0, 128], sizes = [8, 128], strides = [1, 1]} : vector<8x256xf32> to vector<8x128xf32>
    %c40_65 = arith.constant 40 : index
    %c0_66 = arith.constant 0 : index
    %67 = vector.load %arg6[%c40_65, %c0_66] : memref<64x128xf32, #tpu.memory_space<vmem>>, vector<8x128xf32>
    tpu.vector_store %arg6[%c40_65, %c0_66], %66 {strides = array<i32>} : memref<64x128xf32, #tpu.memory_space<vmem>>, vector<8x128xf32>,
    %68 = arith.truncf %65 : vector<8x128xf32> to vector<8x128xbf16>
    %c0_67 = arith.constant 0 : index
    %c0_68 = arith.constant 0 : index
    %69 = vector.load %arg9[%c0_67, %c0_68] : memref<8x128xbf16, #tpu.memory_space<vmem>>, vector<8x128xbf16>
    tpu.vector_store %arg9[%c0_67, %c0_68], %68 {strides = array<i32>} : memref<8x128xbf16, #tpu.memory_space<vmem>>, vector<8x128xbf16>,
    %c0_69 = arith.constant 0 : index
    %c0_70 = arith.constant 0 : index
    %70 = vector.load %arg9[%c0_69, %c0_70] : memref<8x128xbf16, #tpu.memory_space<vmem>>, vector<8x128xbf16>
    %c0_71 = arith.constant 0 : index
    %c0_72 = arith.constant 0 : index
    %71 = vector.load %arg4[%c0_71, %c0_72] : memref<128x256xbf16, #tpu.memory_space<vmem>>, vector<128x256xbf16>
    %cst_73 = arith.constant dense<0.000000e+00> : vector<8x256xf32>
    %72 = tpu.matmul %70, %71, %cst_73 {dimension_numbers = #tpu.dot_dimension_numbers<[1], [0], [0], [1], [0, 0, 1, 1], [], []>} : vector<8x128xbf16>, vector<128x256xbf16>, vector<8x256xf32> -> vector<8x256xf32>
    %c48 = arith.constant 48 : index
    %c0_74 = arith.constant 0 : index
    %73 = vector.load %arg8[%c48, %c0_74] : memref<64x256xf32, #tpu.memory_space<vmem>>, vector<8x256xf32>
    %74 = arith.addf %73, %72 : vector<8x256xf32>
    %75 = vector.extract_strided_slice %74 {offsets = [0, 0], sizes = [8, 128], strides = [1, 1]} : vector<8x256xf32> to vector<8x128xf32>
    %76 = vector.extract_strided_slice %74 {offsets = [0, 128], sizes = [8, 128], strides = [1, 1]} : vector<8x256xf32> to vector<8x128xf32>
    %c48_75 = arith.constant 48 : index
    %c0_76 = arith.constant 0 : index
    %77 = vector.load %arg6[%c48_75, %c0_76] : memref<64x128xf32, #tpu.memory_space<vmem>>, vector<8x128xf32>
    tpu.vector_store %arg6[%c48_75, %c0_76], %76 {strides = array<i32>} : memref<64x128xf32, #tpu.memory_space<vmem>>, vector<8x128xf32>,
    %78 = arith.truncf %75 : vector<8x128xf32> to vector<8x128xbf16>
    %c0_77 = arith.constant 0 : index
    %c0_78 = arith.constant 0 : index
    %79 = vector.load %arg9[%c0_77, %c0_78] : memref<8x128xbf16, #tpu.memory_space<vmem>>, vector<8x128xbf16>
    tpu.vector_store %arg9[%c0_77, %c0_78], %78 {strides = array<i32>} : memref<8x128xbf16, #tpu.memory_space<vmem>>, vector<8x128xbf16>,
    %c0_79 = arith.constant 0 : index
    %c0_80 = arith.constant 0 : index
    %80 = vector.load %arg9[%c0_79, %c0_80] : memref<8x128xbf16, #tpu.memory_space<vmem>>, vector<8x128xbf16>
    %c0_81 = arith.constant 0 : index
    %c0_82 = arith.constant 0 : index
    %81 = vector.load %arg4[%c0_81, %c0_82] : memref<128x256xbf16, #tpu.memory_space<vmem>>, vector<128x256xbf16>
    %cst_83 = arith.constant dense<0.000000e+00> : vector<8x256xf32>
    %82 = tpu.matmul %80, %81, %cst_83 {dimension_numbers = #tpu.dot_dimension_numbers<[1], [0], [0], [1], [0, 0, 1, 1], [], []>} : vector<8x128xbf16>, vector<128x256xbf16>, vector<8x256xf32> -> vector<8x256xf32>
    %c56 = arith.constant 56 : index
    %c0_84 = arith.constant 0 : index
    %83 = vector.load %arg8[%c56, %c0_84] : memref<64x256xf32, #tpu.memory_space<vmem>>, vector<8x256xf32>
    %84 = arith.addf %83, %82 : vector<8x256xf32>
    %85 = vector.extract_strided_slice %84 {offsets = [0, 0], sizes = [8, 128], strides = [1, 1]} : vector<8x256xf32> to vector<8x128xf32>
    %86 = vector.extract_strided_slice %84 {offsets = [0, 128], sizes = [8, 128], strides = [1, 1]} : vector<8x256xf32> to vector<8x128xf32>
    %c56_85 = arith.constant 56 : index
    %c0_86 = arith.constant 0 : index
    %87 = vector.load %arg6[%c56_85, %c0_86] : memref<64x128xf32, #tpu.memory_space<vmem>>, vector<8x128xf32>
    tpu.vector_store %arg6[%c56_85, %c0_86], %86 {strides = array<i32>} : memref<64x128xf32, #tpu.memory_space<vmem>>, vector<8x128xf32>,
    %88 = arith.truncf %85 : vector<8x128xf32> to vector<8x128xbf16>
    %c0_87 = arith.constant 0 : index
    %c0_88 = arith.constant 0 : index
    %89 = vector.load %arg9[%c0_87, %c0_88] : memref<8x128xbf16, #tpu.memory_space<vmem>>, vector<8x128xbf16>
    tpu.vector_store %arg9[%c0_87, %c0_88], %88 {strides = array<i32>} : memref<8x128xbf16, #tpu.memory_space<vmem>>, vector<8x128xbf16>,
    %c0_i32_89 = arith.constant 0 : i32
    %90 = arith.cmpi eq, %arg0, %c0_i32_89 : i32
    %91 = arith.extui %90 : i1 to i32
    %c0_i32_90 = arith.constant 0 : i32
    %92 = arith.cmpi ne, %91, %c0_i32_90 : i32
    scf.if %92 {
      %c0_97 = arith.constant 0 : index
      %c0_98 = arith.constant 0 : index
      %105 = vector.load %arg7[%c0_97, %c0_98] : memref<8x128xf32, #tpu.memory_space<vmem>>, vector<8x128xf32>
      tpu.vector_store %arg7[%c0_97, %c0_98], %85 {strides = array<i32>} : memref<8x128xf32, #tpu.memory_space<vmem>>, vector<8x128xf32>,
    } else {
    }
    %c0_91 = arith.constant 0 : index
    %c0_92 = arith.constant 0 : index
    %93 = vector.load %arg6[%c0_91, %c0_92] : memref<64x128xf32, #tpu.memory_space<vmem>>, vector<64x128xf32>
    %cst_93 = arith.constant dense<0xFF800000> : vector<64xf32>
    %94 = vector.multi_reduction <maximumf>, %93, %cst_93 [1] : vector<64x128xf32> to vector<64xf32>
    %95 = vector.shape_cast %94 : vector<64xf32> to vector<64x1xf32>
    %96 = vector.broadcast %95 : vector<64x1xf32> to vector<64x128xf32>
    %97 = arith.subf %93, %96 : vector<64x128xf32>
    %98 = math.exp %97 : vector<64x128xf32>
    %cst_94 = arith.constant dense<0.000000e+00> : vector<64xf32>
    %99 = vector.multi_reduction <add>, %98, %cst_94 [1] : vector<64x128xf32> to vector<64xf32>
    %100 = vector.shape_cast %99 : vector<64xf32> to vector<64x1xf32>
    %101 = math.log %100 : vector<64x1xf32>
    %102 = vector.broadcast %101 : vector<64x1xf32> to vector<64x128xf32>
    %103 = arith.subf %97, %102 : vector<64x128xf32>
    %c0_95 = arith.constant 0 : index
    %c0_96 = arith.constant 0 : index
    %104 = vector.load %arg6[%c0_95, %c0_96] : memref<64x128xf32, #tpu.memory_space<vmem>>, vector<64x128xf32>
    tpu.vector_store %arg6[%c0_95, %c0_96], %103 {strides = array<i32>} : memref<64x128xf32, #tpu.memory_space<vmem>>, vector<64x128xf32>,
    return
  }
  func.func @transform_0(%arg0: i32) -> (i32, i32) {
    %c0_i32 = arith.constant 0 : i32
    %c0_i32_0 = arith.constant 0 : i32
    return %arg0, %c0_i32 : i32, i32
  }
  func.func @transform_1(%arg0: i32) -> (i32, i32) {
    %c0_i32 = arith.constant 0 : i32
    %c0_i32_0 = arith.constant 0 : i32
    %c0_i32_1 = arith.constant 0 : i32
    return %c0_i32, %c0_i32_0 : i32, i32
  }
  func.func @transform_2(%arg0: i32) -> (i32, i32) {
    %c0_i32 = arith.constant 0 : i32
    %c0_i32_0 = arith.constant 0 : i32
    %c0_i32_1 = arith.constant 0 : i32
    return %c0_i32, %c0_i32_0 : i32, i32
  }
  func.func @transform_3(%arg0: i32) -> (i32, i32) {
    %c0_i32 = arith.constant 0 : i32
    %c0_i32_0 = arith.constant 0 : i32
    %c0_i32_1 = arith.constant 0 : i32
    return %c0_i32, %c0_i32_0 : i32, i32
  }
  func.func @transform_4(%arg0: i32) -> (i32, i32) {
    %c0_i32 = arith.constant 0 : i32
    %c0_i32_0 = arith.constant 0 : i32
    %c0_i32_1 = arith.constant 0 : i32
    return %c0_i32, %c0_i32_0 : i32, i32
  }
  func.func @transform_5(%arg0: i32) -> (i32, i32) {
    %c0_i32 = arith.constant 0 : i32
    %c0_i32_0 = arith.constant 0 : i32
    return %arg0, %c0_i32 : i32, i32
  }
  func.func @transform_6(%arg0: i32) -> (i32, i32) {
    %c0_i32 = arith.constant 0 : i32
    %c0_i32_0 = arith.constant 0 : i32
    %c0_i32_1 = arith.constant 0 : i32
    return %c0_i32, %c0_i32_0 : i32, i32
  }
}

</mosaic_0001>

<bundles_post_ra>
// kernel: rnn_forward_sequence.1
= control target key start
LH: loop header
LB: loop body
LE: loop exit
PB: predicated region body
PF: predicated region fallthrough
CT: control target
= control target key end

     0   :  { %v1783_v1 = vmov 0   ;;  %v55_v39 = vlaneseq  ;;  %s2238_s2 = inlined_call_operand.vmem [shape: bf16[128,256], index: 2, kind: input, shape index: {}]   ;;  %s2239_s3 = inlined_call_operand.vmem [shape: bf16[128,256], index: 3, kind: input, shape index: {}]   ;;  %s2240_s1 = inlined_call_operand.vmem [shape: bf16[8,128], index: 1, kind: input, shape index: {}]   ;;  %s2241_s0 = inlined_call_operand.vmem [shape: bf16[64,128], index: 0, kind: input, shape index: {}]   ;;  %s2242_s4 = inlined_call_operand.vmem [shape: f32[1,256], index: 4, kind: input, shape index: {}]   ;;  %s2243_s5 = inlined_call_operand.vmem [shape: f32[64,128], index: 5, kind: output, shape index: {0}]   ;;  %s2244_s6 = inlined_call_operand.vmem [shape: f32[8,128], index: 6, kind: output, shape index: {1}]  }
   0x1   :  { %v1675_v0 = vld [vmem:[%s2238_s2 + $0x4] ss:$8 sps:$4 sm:$0xff]   ;;  %201 = vmatprep.mubr.bf16.mxu0 %v1783_v1  ;;  %387 = vmatprep.mubr.bf16.mxu1 %v1783_v1  ;;  %v1679_v3 = vld [vmem:[%s2238_s2] ss:$8 sps:$4 sm:$0xff]   ;;  %v1681_v5 = vld [vmem:[%s2238_s2 + $0x14] ss:$8 sps:$4 sm:$0xff]  }
   0x2   :  { %v1827_v2 = vld [vmem:[%s2239_s3 + $0x4] ss:$8 sps:$4 sm:$0xff]   ;;  %169 = vmatprep.subr.bf16.mxu0 %v1675_v0  ;;  %v1835_v4 = vld [vmem:[%s2239_s3] ss:$8 sps:$4 sm:$0xff]   ;;  %v1845_v6 = vld [vmem:[%s2239_s3 + $0x14] ss:$8 sps:$4 sm:$0xff]  }
   0x3   :  { %355 = vmatprep.subr.bf16.mxu1 %v1827_v2  ;;  %170 = vmatpush1.bf16.msra.mxu0 %v1679_v3  ;;  %v1685_v7 = vld [vmem:[%s2238_s2 + $0x10] ss:$8 sps:$4 sm:$0xff]   ;;  %v1687_v9 = vld [vmem:[%s2238_s2 + $0x24] ss:$8 sps:$4 sm:$0xff]   ;;  %v1691_v11 = vld [vmem:[%s2238_s2 + $0x20] ss:$8 sps:$4 sm:$0xff]  }
   0x4   :  { %356 = vmatpush1.bf16.msra.mxu1 %v1835_v4  ;;  %171 = vmatprep.subr.bf16.mxu0 %v1681_v5  ;;  %v1853_v8 = vld [vmem:[%s2239_s3 + $0x10] ss:$8 sps:$4 sm:$0xff]   ;;  %v1862_v10 = vld [vmem:[%s2239_s3 + $0x24] ss:$8 sps:$4 sm:$0xff]   ;;  %v1870_v12 = vld [vmem:[%s2239_s3 + $0x20] ss:$8 sps:$4 sm:$0xff]  }
   0x5   :  { %357 = vmatprep.subr.bf16.mxu1 %v1845_v6  ;;  %v1693_v13 = vld [vmem:[%s2238_s2 + $0x34] ss:$8 sps:$4 sm:$0xff]   ;;  %v1697_v15 = vld [vmem:[%s2238_s2 + $0x30] ss:$8 sps:$4 sm:$0xff]   ;;  %v1699_v17 = vld [vmem:[%s2238_s2 + $0x44] ss:$8 sps:$4 sm:$0xff]  }
   0x6   :  { %v1880_v14 = vld [vmem:[%s2239_s3 + $0x34] ss:$8 sps:$4 sm:$0xff]   ;;  %v1889_v16 = vld [vmem:[%s2239_s3 + $0x30] ss:$8 sps:$4 sm:$0xff]   ;;  %v1898_v18 = vld [vmem:[%s2239_s3 + $0x44] ss:$8 sps:$4 sm:$0xff]  }
   0x7   :  { %172 = vmatpush1.bf16.msra.mxu0 %v1685_v7  ;;  %v1703_v19 = vld [vmem:[%s2238_s2 + $0x40] ss:$8 sps:$4 sm:$0xff]   ;;  %v1705_v21 = vld [vmem:[%s2238_s2 + $0x54] ss:$8 sps:$4 sm:$0xff]   ;;  %v1709_v23 = vld [vmem:[%s2238_s2 + $0x50] ss:$8 sps:$4 sm:$0xff]  }
   0x8   :  { %358 = vmatpush1.bf16.msra.mxu1 %v1853_v8  ;;  %173 = vmatprep.subr.bf16.mxu0 %v1687_v9  ;;  %v1906_v20 = vld [vmem:[%s2239_s3 + $0x40] ss:$8 sps:$4 sm:$0xff]   ;;  %v1916_v22 = vld [vmem:[%s2239_s3 + $0x54] ss:$8 sps:$4 sm:$0xff]   ;;  %v1925_v24 = vld [vmem:[%s2239_s3 + $0x50] ss:$8 sps:$4 sm:$0xff]  }
   0x9   :  { %359 = vmatprep.subr.bf16.mxu1 %v1862_v10  ;;  %v1711_v25 = vld [vmem:[%s2238_s2 + $0x64] ss:$8 sps:$4 sm:$0xff]   ;;  %v1715_v27 = vld [vmem:[%s2238_s2 + $0x60] ss:$8 sps:$4 sm:$0xff]   ;;  %v1717_v30 = vld [vmem:[%s2238_s2 + $0x74] ss:$8 sps:$4 sm:$0xff]  }
   0xa   :  { %v1934_v26 = vld [vmem:[%s2239_s3 + $0x64] ss:$8 sps:$4 sm:$0xff]   ;;  %v27_v28 = vld [vmem:[%s2240_s1] sm:$0xf]  ;;  %v1954_v31 = vld [vmem:[%s2239_s3 + $0x74] ss:$8 sps:$4 sm:$0xff]  }
   0xb   :  { %174 = vmatpush1.bf16.msra.mxu0 %v1691_v11  ;;  %v1945_v29 = vld [vmem:[%s2239_s3 + $0x60] ss:$8 sps:$4 sm:$0xff]   ;;  %28 = vst [vmem:[#allocation3] sm:$0xf] %v27_v28  ;;  %v1721_v32 = vld [vmem:[%s2238_s2 + $0x70] ss:$8 sps:$4 sm:$0xff]  }
   0xc   :  { %360 = vmatpush1.bf16.msra.mxu1 %v1870_v12  ;;  %175 = vmatprep.subr.bf16.mxu0 %v1693_v13  ;;  %v1963_v33 = vld [vmem:[%s2239_s3 + $0x70] ss:$8 sps:$4 sm:$0xff]   ;;  %v1723_v34 = vld [vmem:[%s2241_s0] sm:$0xff]   ;;  %v1724_v36 = vld [vmem:[%s2241_s0 + $0x8] sm:$0xff]   ;;  %v56_v40 = vshrl.u32 %v55_v39, 7 }
   0xd   :  { %361 = vmatprep.subr.bf16.mxu1 %v1880_v14  ;;  %v1725_v37 = vld [vmem:[%s2241_s0 + $0x10] sm:$0xff]   ;;  %v1726_v38 = vld [vmem:[%s2241_s0 + $0x18] sm:$0xff]   ;;  %v53_v42 = vld [vmem:[%s2242_s4] sm:$0x3] }
   0xe   :  { %v57_v41 = vsub.s32 0, %v56_v40  ;;  %v61_v43 = vsub.s32 1, %v56_v40 }
   0xf   :  { %176 = vmatpush1.bf16.msra.mxu0 %v1697_v15 }
  0x10   :  { %362 = vmatpush1.bf16.msra.mxu1 %v1889_v16  ;;  %177 = vmatprep.subr.bf16.mxu0 %v1699_v17  ;;  %v2022_v44 = vrot.slane %v53_v42, %v57_v41  ;;  %v2024_v45 = vrot.slane %v53_v42, %v61_v43 }
  0x11   :  { %363 = vmatprep.subr.bf16.mxu1 %v1898_v18 }
  0x12   :  { %v258_v35 = vld [vmem:[#allocation3] sm:$0xf] }
  0x13   :  { %178 = vmatpush1.bf16.msra.mxu0 %v1703_v19 }
  0x14   :  { %364 = vmatpush1.bf16.msra.mxu1 %v1906_v20  ;;  %179 = vmatprep.subr.bf16.mxu0 %v1705_v21 }
  0x15   :  { %365 = vmatprep.subr.bf16.mxu1 %v1916_v22 }
  0x17   :  { %180 = vmatpush1.bf16.msra.mxu0 %v1709_v23 }
  0x18   :  { %366 = vmatpush1.bf16.msra.mxu1 %v1925_v24  ;;  %181 = vmatprep.subr.bf16.mxu0 %v1711_v25 }
  0x19   :  { %367 = vmatprep.subr.bf16.mxu1 %v1934_v26 }
  0x1b   :  { %182 = vmatpush1.bf16.msra.mxu0 %v1715_v27 }
  0x1c   :  { %368 = vmatpush1.bf16.msra.mxu1 %v1945_v29  ;;  %183 = vmatprep.subr.bf16.mxu0 %v1717_v30 }
  0x1d   :  { %369 = vmatprep.subr.bf16.mxu1 %v1954_v31 }
  0x1f   :  { %184 = vmatpush1.bf16.msra.mxu0 %v1721_v32 }
  0x20   :  { %370 = vmatpush1.bf16.msra.mxu1 %v1963_v33  ;;  %500 = vmatprep.subr.bf16.mxu0 %v1827_v2 }
  0x21   :  { %645 = vmatprep.subr.bf16.mxu1 %v1827_v2 }
  0x22   :  { %202 = vmatmul.mubr.bf16.vlgmr.msra.gmra.mrb[0].mxu0 %v1723_v34 }
  0x23   :  { %388 = vmatmul.mubr.bf16.vlgmr.msra.gmra.mrb[0].mxu1 %v258_v35  ;;  %501 = vmatpush1.bf16.msra.mxu0 %v1835_v4 }
  0x24   :  { %211 = vmatprep.mubr.bf16.mxu0 %v1783_v1  ;;  %502 = vmatprep.subr.bf16.mxu0 %v1845_v6 }
  0x25   :  { %646 = vmatpush1.bf16.msra.mxu1 %v1835_v4  ;;  %677 = vmatprep.mubr.bf16.mxu1 %v1783_v1 }
  0x26   :  { %647 = vmatprep.subr.bf16.mxu1 %v1845_v6 }
  0x27   :  { %503 = vmatpush1.bf16.msra.mxu0 %v1853_v8 }
  0x28   :  { %504 = vmatprep.subr.bf16.mxu0 %v1862_v10 }
  0x29   :  { %648 = vmatpush1.bf16.msra.mxu1 %v1853_v8 }
  0x2a   :  { %649 = vmatprep.subr.bf16.mxu1 %v1862_v10  ;;  %212 = vmatmul.mubr.bf16.gmra.mrb[4].mxu0 %v1724_v36 }
  0x2b   :  { %505 = vmatpush1.bf16.msra.mxu0 %v1870_v12  ;;  %221 = vmatprep.mubr.bf16.mxu0 %v1783_v1 }
  0x2c   :  { %506 = vmatprep.subr.bf16.mxu0 %v1880_v14 }
  0x2d   :  { %650 = vmatpush1.bf16.msra.mxu1 %v1870_v12 }
  0x2e   :  { %651 = vmatprep.subr.bf16.mxu1 %v1880_v14 }
  0x2f   :  { %507 = vmatpush1.bf16.msra.mxu0 %v1889_v16 }
  0x30   :  { %508 = vmatprep.subr.bf16.mxu0 %v1898_v18 }
  0x31   :  { %652 = vmatpush1.bf16.msra.mxu1 %v1889_v16 }
  0x32   :  { %653 = vmatprep.subr.bf16.mxu1 %v1898_v18  ;;  %222 = vmatmul.mubr.bf16.gmra.mrb[8].mxu0 %v1725_v37 }
  0x33   :  { %509 = vmatpush1.bf16.msra.mxu0 %v1906_v20  ;;  %231 = vmatprep.mubr.bf16.mxu0 %v1783_v1 }
  0x34   :  { %510 = vmatprep.subr.bf16.mxu0 %v1916_v22 }
  0x35   :  { %654 = vmatpush1.bf16.msra.mxu1 %v1906_v20 }
  0x36   :  { %655 = vmatprep.subr.bf16.mxu1 %v1916_v22 }
  0x37   :  { %511 = vmatpush1.bf16.msra.mxu0 %v1925_v24 }
  0x38   :  { %512 = vmatprep.subr.bf16.mxu0 %v1934_v26 }
  0x39   :  { %656 = vmatpush1.bf16.msra.mxu1 %v1925_v24 }
  0x3a   :  { %657 = vmatprep.subr.bf16.mxu1 %v1934_v26  ;;  %232 = vmatmul.mubr.bf16.gmra.mrb[12].mxu0 %v1726_v38 }
  0x3b   :  { %513 = vmatpush1.bf16.msra.mxu0 %v1945_v29  ;;  %532 = vmatprep.mubr.bf16.mxu0 %v1783_v1 }
  0x3c   :  { %514 = vmatprep.subr.bf16.mxu0 %v1954_v31 }
  0x3d   :  { %658 = vmatpush1.bf16.msra.mxu1 %v1945_v29 }
  0x3e   :  { %659 = vmatprep.subr.bf16.mxu1 %v1954_v31 }
  0x3f   :  { %515 = vmatpush1.bf16.msra.mxu0 %v1963_v33 }
  0x40   :  { %790 = vmatprep.subr.bf16.mxu0 %v1827_v2 }
  0x41   :  { %660 = vmatpush1.bf16.msra.mxu1 %v1963_v33 }
  0x42   :  { %935 = vmatprep.subr.bf16.mxu1 %v1827_v2 }
  0xf5   :  { %v203_v46 = vpop.f32.mrb[0].mxu0 }
  0xf6   :  { %v389_v47 = vpop.f32.mrb[0].mxu1  ;;  %v204_v48 = vadd.f32 %v203_v46, %v2022_v44  ;;  %v205_v49 = vpop.f32.mrb[1].mxu0 }
  0xf7   :  { %v391_v50 = vpop.f32.mrb[1].mxu1  ;;  %v206_v51 = vadd.f32 %v205_v49, %v2024_v45  ;;  %v207_v52 = vpop.f32.mrb[2].mxu0 }
  0xf8   :  { %v393_v53 = vpop.f32.mrb[2].mxu1  ;;  %v398_v54 = vadd.f32 %v389_v47, %v204_v48  ;;  %v209_v55 = vpop.f32.mrb[3].mxu0  ;;  %v208_v17 = vadd.f32 %v207_v52, %v2022_v44 }
  0xf9   :  { %v394_v56 = vpop.f32.mrb[3].mxu1  ;;  %v2028_v57 = vadd.f32 %v391_v50, %v206_v51  ;;  %v210_v19 = vadd.f32 %v209_v55, %v2024_v45 }
  0xfa   :  { %v401_v58 = vpack.c.bf16 %v398_v54, %v398_v54 }
  0xfb   :  { %1430 = vmax.xlane.f32.xlu0 %v2028_v57 }
  0xfc   :  { %402 = vst [vmem:[#allocation3] sm:$0xf] %v401_v58 }
  0xfd   :  { %v213_v60 = vpop.f32.mrb[4].mxu0 }
  0xfe   :  { %v215_v61 = vpop.f32.mrb[5].mxu0  ;;  %v214_v35 = vadd.f32 %v213_v60, %v2022_v44 }
  0xff   :  { %v2038_v62 = vpop.f32.mrb[6].mxu0  ;;  %v216_v36 = vadd.f32 %v215_v61, %v2024_v45 }
 0x100   :  { %v2040_v63 = vpop.f32.mrb[7].mxu0 }
 0x101   :  { %v220_v47 = vadd.f32 %v2040_v63, %v2024_v45  ;;  %v1732_v63 = vld [vmem:[%s2239_s3 + $0x14] ss:$8 sps:$4 sm:$0xff]  }
 0x103   :  { %v403_v59 = vld [vmem:[#allocation3] sm:$0xf] }
 0x104   :  { %533 = vmatmul.mubr.bf16.vlgmr.msra.gmra.mrb[16].mxu0 %v403_v59 }
 0x105   :  { %791 = vmatpush1.bf16.msra.mxu0 %v1835_v4  ;;  %822 = vmatprep.mubr.bf16.mxu0 %v1783_v1  ;;  %v2042_v0 = vpop.f32.mrb[8].mxu0 }
 0x106   :  { %792 = vmatprep.subr.bf16.mxu0 %v1845_v6  ;;  %v2045_v3 = vpop.f32.mrb[9].mxu0 }
 0x107   :  { %v2048_v5 = vpop.f32.mrb[10].mxu0 }
 0x108   :  { %v2050_v7 = vpop.f32.mrb[11].mxu0 }
 0x109   :  { %793 = vmatpush1.bf16.msra.mxu0 %v1853_v8 }
 0x10a   :  { %794 = vmatprep.subr.bf16.mxu0 %v1862_v10 }
 0x10d   :  { %795 = vmatpush1.bf16.msra.mxu0 %v1870_v12  ;;  %v2060_v9 = vpop.f32.mrb[12].mxu0 }
 0x10e   :  { %796 = vmatprep.subr.bf16.mxu0 %v1880_v14  ;;  %v2062_v11 = vpop.f32.mrb[13].mxu0 }
 0x10f   :  { %v2064_v13 = vpop.f32.mrb[14].mxu0 }
 0x110   :  { %v2066_v15 = vpop.f32.mrb[15].mxu0 }
 0x111   :  { %797 = vmatpush1.bf16.msra.mxu0 %v1889_v16 }
 0x112   :  { %798 = vmatprep.subr.bf16.mxu0 %v1898_v18 }
 0x115   :  { %799 = vmatpush1.bf16.msra.mxu0 %v1906_v20 }
 0x116   :  { %800 = vmatprep.subr.bf16.mxu0 %v1916_v22 }
 0x119   :  { %801 = vmatpush1.bf16.msra.mxu0 %v1925_v24 }
 0x11a   :  { %802 = vmatprep.subr.bf16.mxu0 %v1934_v26 }
 0x11d   :  { %803 = vmatpush1.bf16.msra.mxu0 %v1945_v29 }
 0x11e   :  { %804 = vmatprep.subr.bf16.mxu0 %v1954_v31 }
 0x121   :  { %805 = vmatpush1.bf16.msra.mxu0 %v1963_v33 }
 0x122   :  { %1080 = vmatprep.subr.bf16.mxu0 %v1827_v2 }
 0x1d7   :  { %v534_v21 = vpop.f32.mrb[16].mxu0 }
 0x1d8   :  { %v543_v23 = vadd.f32 %v534_v21, %v208_v17  ;;  %v536_v25 = vpop.f32.mrb[17].mxu0  ;;  %v1736_v17 = vld [vmem:[%s2239_s3 + $0x30] ss:$8 sps:$4 sm:$0xff]   ;;  %v1739_v21 = vld [vmem:[%s2239_s3 + $0x40] ss:$8 sps:$4 sm:$0xff]  }
 0x1d9   :  { %v2070_v27 = vadd.f32 %v536_v25, %v210_v19  ;;  %v538_v28 = vpop.f32.mrb[18].mxu0  ;;  %v1741_v19 = vld [vmem:[%s2239_s3 + $0x44] ss:$8 sps:$4 sm:$0xff]   ;;  %v1742_v25 = vld [vmem:[%s2239_s3 + $0x50] ss:$8 sps:$4 sm:$0xff]  }
 0x1da   :  { %v546_v30 = vpack.c.bf16 %v543_v23, %v543_v23  ;;  %v539_v32 = vpop.f32.mrb[19].mxu0  ;;  %v1744_v23 = vld [vmem:[%s2239_s3 + $0x54] ss:$8 sps:$4 sm:$0xff]   ;;  %v1747_v28 = vld [vmem:[%s2239_s3 + $0x64] ss:$8 sps:$4 sm:$0xff]  }
 0x1db   :  { %1432 = vmax.xlane.f32.xlu0 %v2070_v27  ;;  %v1750_v32 = vld [vmem:[%s2239_s3 + $0x74] ss:$8 sps:$4 sm:$0xff]  }
 0x1dc   :  { %547 = vst [vmem:[#allocation3] sm:$0xf] %v546_v30  ;;  %v1745_v30 = vld [vmem:[%s2239_s3 + $0x60] ss:$8 sps:$4 sm:$0xff]  }
 0x1e3   :  { %v548_v34 = vld [vmem:[#allocation3] sm:$0xf] }
 0x1e4   :  { %678 = vmatmul.mubr.bf16.vlgmr.msra.gmra.mrb[4].mxu1 %v548_v34  ;;  %v1748_v34 = vld [vmem:[%s2239_s3 + $0x70] ss:$8 sps:$4 sm:$0xff]  }
 0x1e5   :  { %936 = vmatpush1.bf16.msra.mxu1 %v1835_v4  ;;  %967 = vmatprep.mubr.bf16.mxu1 %v1783_v1 }
 0x1e6   :  { %937 = vmatprep.subr.bf16.mxu1 %v1845_v6 }
 0x1e9   :  { %938 = vmatpush1.bf16.msra.mxu1 %v1853_v8 }
 0x1ea   :  { %939 = vmatprep.subr.bf16.mxu1 %v1862_v10 }
 0x1ed   :  { %940 = vmatpush1.bf16.msra.mxu1 %v1870_v12 }
 0x1ee   :  { %941 = vmatprep.subr.bf16.mxu1 %v1880_v14 }
 0x1f1   :  { %942 = vmatpush1.bf16.msra.mxu1 %v1889_v16 }
 0x1f2   :  { %943 = vmatprep.subr.bf16.mxu1 %v1898_v18 }
 0x1f5   :  { %944 = vmatpush1.bf16.msra.mxu1 %v1906_v20 }
 0x1f6   :  { %945 = vmatprep.subr.bf16.mxu1 %v1916_v22 }
 0x1f9   :  { %946 = vmatpush1.bf16.msra.mxu1 %v1925_v24 }
 0x1fa   :  { %947 = vmatprep.subr.bf16.mxu1 %v1934_v26 }
 0x1fd   :  { %948 = vmatpush1.bf16.msra.mxu1 %v1945_v29 }
 0x1fe   :  { %949 = vmatprep.subr.bf16.mxu1 %v1954_v31 }
 0x201   :  { %950 = vmatpush1.bf16.msra.mxu1 %v1963_v33 }
 0x202   :  { %1225 = vmatprep.subr.bf16.mxu1 %v1827_v2  ;;  %v218_v2 = vadd.f32 %v2038_v62, %v2022_v44  ;;  %v1729_v62 = vld [vmem:[%s2239_s3 + $0x4] ss:$8 sps:$4 sm:$0xff]  }
 0x2b7   :  { %v679_v37 = vpop.f32.mrb[4].mxu1 }
 0x2b8   :  { %v688_v38 = vadd.f32 %v679_v37, %v214_v35  ;;  %v681_v39 = vpop.f32.mrb[5].mxu1  ;;  %v1431_v35 = vpop.xlane.xlu0 %1430 }
 0x2b9   :  { %v2092_v40 = vadd.f32 %v681_v39, %v216_v36  ;;  %v683_v41 = vpop.f32.mrb[6].mxu1  ;;  %v1446_v36 = vsub.f32 %v2028_v57, %v1431_v35 }
 0x2ba   :  { %v691_v42 = vpack.c.bf16 %v688_v38, %v688_v38  ;;  %v684_v43 = vpop.f32.mrb[7].mxu1 }
 0x2bb   :  { %1434 = vmax.xlane.f32.xlu1 %v2092_v40  ;;  %v1454_v39 = vmul.f32 1.442695, %v1446_v36 }
 0x2bc   :  { %692 = vst [vmem:[#allocation3] sm:$0xf] %v691_v42  ;;  %v1433_v37 = vpop.xlane.xlu0 %1432 }
 0x2bd   :  { %1751 = vpow2.f32 %v1454_v39 }
 0x2c3   :  { %v693_v46 = vld [vmem:[#allocation3] sm:$0xf] }
 0x2c4   :  { %823 = vmatmul.mubr.bf16.vlgmr.msra.gmra.mrb[20].mxu0 %v693_v46 }
 0x2c5   :  { %1081 = vmatpush1.bf16.msra.mxu0 %v1835_v4  ;;  %1112 = vmatprep.mubr.bf16.mxu0 %v1783_v1 }
 0x2c6   :  { %1082 = vmatprep.subr.bf16.mxu0 %v1845_v6 }
 0x2c9   :  { %1083 = vmatpush1.bf16.msra.mxu0 %v1853_v8 }
 0x2ca   :  { %1084 = vmatprep.subr.bf16.mxu0 %v1862_v10 }
 0x2cd   :  { %1085 = vmatpush1.bf16.msra.mxu0 %v1870_v12 }
 0x2ce   :  { %1086 = vmatprep.subr.bf16.mxu0 %v1880_v14 }
 0x2d1   :  { %1087 = vmatpush1.bf16.msra.mxu0 %v1889_v16 }
 0x2d2   :  { %1088 = vmatprep.subr.bf16.mxu0 %v1898_v18 }
 0x2d5   :  { %1089 = vmatpush1.bf16.msra.mxu0 %v1906_v20 }
 0x2d6   :  { %1090 = vmatprep.subr.bf16.mxu0 %v1916_v22 }
 0x2d9   :  { %1091 = vmatpush1.bf16.msra.mxu0 %v1925_v24 }
 0x2da   :  { %1092 = vmatprep.subr.bf16.mxu0 %v1934_v26 }
 0x2dd   :  { %1093 = vmatpush1.bf16.msra.mxu0 %v1945_v29 }
 0x2de   :  { %1094 = vmatprep.subr.bf16.mxu0 %v1954_v31 }
 0x2e1   :  { %1095 = vmatpush1.bf16.msra.mxu0 %v1963_v33 }
 0x2e2   :  { %1370 = vmatprep.subr.bf16.mxu0 %v1729_v62 }
 0x348   :  { %v1435_v38 = vpop.xlane.xlu1 %1434 }
 0x349   :  { %v1448_v41 = vsub.f32 %v2092_v40, %v1435_v38 }
 0x34b   :  { %v1458_v43 = vmul.f32 1.442695, %v1448_v41 }
 0x34d   :  { %1753 = vpow2.f32 %v1458_v43 }
 0x397   :  { %v824_v48 = vpop.f32.mrb[20].mxu0 }
 0x398   :  { %v833_v49 = vadd.f32 %v824_v48, %v218_v2  ;;  %v826_v50 = vpop.f32.mrb[21].mxu0  ;;  %v234_v2 = vadd.f32 %v2060_v9, %v2022_v44 }
 0x399   :  { %v2115_v51 = vadd.f32 %v826_v50, %v220_v47  ;;  %v828_v52 = vpop.f32.mrb[22].mxu0  ;;  %v236_v47 = vadd.f32 %v2062_v11, %v2024_v45 }
 0x39a   :  { %v836_v53 = vpack.c.bf16 %v833_v49, %v833_v49  ;;  %v829_v54 = vpop.f32.mrb[23].mxu0 }
 0x39b   :  { %1436 = vmax.xlane.f32.xlu1 %v2115_v51 }
 0x39c   :  { %837 = vst [vmem:[#allocation3] sm:$0xf] %v836_v53 }
 0x3a3   :  { %v838_v55 = vld [vmem:[#allocation3] sm:$0xf] }
 0x3a4   :  { %968 = vmatmul.mubr.bf16.vlgmr.msra.gmra.mrb[8].mxu1 %v838_v55  ;;  %v1752_v55 = vpop.eup %1751 }
 0x3a5   :  { %1226 = vmatpush1.bf16.msra.mxu1 %v1835_v4  ;;  %1257 = vmatprep.mubr.bf16.mxu1 %v1783_v1  ;;  %v224_v4 = vadd.f32 %v2042_v0, %v2022_v44  ;;  %v1730_v0 = vld [vmem:[%s2239_s3 + $0x10] ss:$8 sps:$4 sm:$0xff]  }
 0x3a6   :  { %1227 = vmatprep.subr.bf16.mxu1 %v1845_v6  ;;  %v226_v6 = vadd.f32 %v2045_v3, %v2024_v45  ;;  %v1735_v3 = vld [vmem:[%s2239_s3 + $0x24] ss:$8 sps:$4 sm:$0xff]  }
 0x3a9   :  { %1228 = vmatpush1.bf16.msra.mxu1 %v1853_v8 }
 0x3aa   :  { %1229 = vmatprep.subr.bf16.mxu1 %v1862_v10 }
 0x3ad   :  { %1230 = vmatpush1.bf16.msra.mxu1 %v1870_v12 }
 0x3ae   :  { %1231 = vmatprep.subr.bf16.mxu1 %v1880_v14 }
 0x3b1   :  { %1232 = vmatpush1.bf16.msra.mxu1 %v1889_v16 }
 0x3b2   :  { %1233 = vmatprep.subr.bf16.mxu1 %v1898_v18 }
 0x3b5   :  { %1234 = vmatpush1.bf16.msra.mxu1 %v1906_v20 }
 0x3b6   :  { %1235 = vmatprep.subr.bf16.mxu1 %v1916_v22 }
 0x3b9   :  { %1236 = vmatpush1.bf16.msra.mxu1 %v1925_v24  ;;  %v228_v24 = vadd.f32 %v2048_v5, %v2022_v44  ;;  %v1733_v5 = vld [vmem:[%s2239_s3 + $0x20] ss:$8 sps:$4 sm:$0xff]  }
 0x3ba   :  { %1237 = vmatprep.subr.bf16.mxu1 %v1934_v26  ;;  %v230_v26 = vadd.f32 %v2050_v7, %v2024_v45  ;;  %v1738_v7 = vld [vmem:[%s2239_s3 + $0x34] ss:$8 sps:$4 sm:$0xff]  }
 0x3bd   :  { %1238 = vmatpush1.bf16.msra.mxu1 %v1945_v29 }
 0x3be   :  { %1239 = vmatprep.subr.bf16.mxu1 %v1954_v31 }
 0x3c1   :  { %1240 = vmatpush1.bf16.msra.mxu1 %v1963_v33 }
 0x477   :  { %v969_v8 = vpop.f32.mrb[8].mxu1 }
 0x478   :  { %v978_v10 = vadd.f32 %v969_v8, %v224_v4  ;;  %v971_v12 = vpop.f32.mrb[9].mxu1  ;;  %v1754_v4 = vpop.eup %1753 }
 0x479   :  { %v2138_v14 = vadd.f32 %v971_v12, %v226_v6  ;;  %v973_v16 = vpop.f32.mrb[10].mxu1 }
 0x47a   :  { %v981_v18 = vpack.c.bf16 %v978_v10, %v978_v10  ;;  %v974_v20 = vpop.f32.mrb[11].mxu1 }
 0x47b   :  { %1438 = vmax.xlane.f32.xlu0 %v2138_v14 }
 0x47c   :  { %982 = vst [vmem:[#allocation3] sm:$0xf] %v981_v18 }
 0x483   :  { %v983_v22 = vld [vmem:[#allocation3] sm:$0xf] }
 0x484   :  { %1113 = vmatmul.mubr.bf16.vlgmr.msra.gmra.mrb[24].mxu0 %v983_v22 }
 0x485   :  { %1402 = vmatprep.mubr.bf16.mxu0 %v1783_v1  ;;  %v1727_v1 = vld [vmem:[%s2239_s3] ss:$8 sps:$4 sm:$0xff]  }
 0x486   :  { %1371 = vmatpush1.bf16.msra.mxu0 %v1727_v1 }
 0x487   :  { %1372 = vmatprep.subr.bf16.mxu0 %v1732_v63 }
 0x48a   :  { %1373 = vmatpush1.bf16.msra.mxu0 %v1730_v0 }
 0x48b   :  { %1374 = vmatprep.subr.bf16.mxu0 %v1735_v3 }
 0x48e   :  { %1375 = vmatpush1.bf16.msra.mxu0 %v1733_v5  ;;  %v238_v5 = vadd.f32 %v2064_v13, %v2022_v44 }
 0x48f   :  { %1376 = vmatprep.subr.bf16.mxu0 %v1738_v7  ;;  %v240_v7 = vadd.f32 %v2066_v15, %v2024_v45 }
 0x492   :  { %1377 = vmatpush1.bf16.msra.mxu0 %v1736_v17 }
 0x493   :  { %1378 = vmatprep.subr.bf16.mxu0 %v1741_v19 }
 0x496   :  { %1379 = vmatpush1.bf16.msra.mxu0 %v1739_v21 }
 0x497   :  { %1380 = vmatprep.subr.bf16.mxu0 %v1744_v23 }
 0x49a   :  { %1381 = vmatpush1.bf16.msra.mxu0 %v1742_v25 }
 0x49b   :  { %1382 = vmatprep.subr.bf16.mxu0 %v1747_v28 }
 0x49e   :  { %1383 = vmatpush1.bf16.msra.mxu0 %v1745_v30 }
 0x49f   :  { %1384 = vmatprep.subr.bf16.mxu0 %v1750_v32 }
 0x4a2   :  { %1385 = vmatpush1.bf16.msra.mxu0 %v1748_v34 }
 0x508   :  { %v1439_v42 = vpop.xlane.xlu0 %1438 }
 0x509   :  { %v1450_v46 = vsub.f32 %v2138_v14, %v1439_v42 }
 0x50b   :  { %v1462_v49 = vmul.f32 1.442695, %v1450_v46 }
 0x50d   :  { %1755 = vpow2.f32 %v1462_v49 }
 0x517   :  { %v1756_v9 = vpop.eup %1755 }
 0x557   :  { %v1114_v29 = vpop.f32.mrb[24].mxu0 }
 0x558   :  { %v1123_v31 = vadd.f32 %v1114_v29, %v228_v24  ;;  %v1116_v33 = vpop.f32.mrb[25].mxu0 }
 0x559   :  { %v2146_v56 = vadd.f32 %v1116_v33, %v230_v26  ;;  %v1118_v58 = vpop.f32.mrb[26].mxu0 }
 0x55a   :  { %v1126_v59 = vpack.c.bf16 %v1123_v31, %v1123_v31  ;;  %v1119_v60 = vpop.f32.mrb[27].mxu0 }
 0x55b   :  { %1440 = vmax.xlane.f32.xlu1 %v2146_v56  ;;  %v1447_v60 = vsub.f32 %v2070_v27, %v1433_v37 }
 0x55c   :  { %1127 = vst [vmem:[#allocation3] sm:$0xf] %v1126_v59 }
 0x55d   :  { %v1456_v1 = vmul.f32 1.442695, %v1447_v60 }
 0x563   :  { %v1128_v61 = vld [vmem:[#allocation3] sm:$0xf] }
 0x564   :  { %1258 = vmatmul.mubr.bf16.vlgmr.msra.gmra.mrb[12].mxu1 %v1128_v61  ;;  %v1437_v61 = vpop.xlane.xlu1 %1436 }
 0x565   :  { %v1449_v62 = vsub.f32 %v2115_v51, %v1437_v61 }
 0x567   :  { %v1460_v0 = vmul.f32 1.442695, %v1449_v62 }
 0x5e8   :  { %v1441_v63 = vpop.xlane.xlu1 %1440 }
 0x5e9   :  { %v1451_v3 = vsub.f32 %v2146_v56, %v1441_v63 }
 0x5eb   :  { %v1464_v19 = vmul.f32 1.442695, %v1451_v3 }
 0x637   :  { %v1259_v48 = vpop.f32.mrb[12].mxu1 }
 0x638   :  { %v1268_v57 = vadd.f32 %v1259_v48, %v234_v2  ;;  %v1261_v50 = vpop.f32.mrb[13].mxu1 }
 0x639   :  { %v1269_v52 = vadd.f32 %v1261_v50, %v236_v47  ;;  %v1263_v53 = vpop.f32.mrb[14].mxu1 }
 0x63a   :  { %v1271_v54 = vpack.c.bf16 %v1268_v57, %v1268_v57  ;;  %v1264_v40 = vpop.f32.mrb[15].mxu1 }
 0x63b   :  { %1442 = vmax.xlane.f32.xlu0 %v1269_v52 }
 0x63c   :  { %1272 = vst [vmem:[#allocation3] sm:$0xf] %v1271_v54 }
 0x63f   :  { %1470 = vadd.xlane.f32.xlu0 %v1752_v55 }
 0x643   :  { %v1273_v6 = vld [vmem:[#allocation3] sm:$0xf]  ;;  %1474 = vadd.xlane.f32.xlu0 %v1754_v4 }
 0x644   :  { %1403 = vmatmul.mubr.bf16.vlgmr.msra.gmra.mrb[28].mxu0 %v1273_v6 }
 0x647   :  { %1478 = vadd.xlane.f32.xlu0 %v1756_v9 }
 0x6c8   :  { %v1443_v11 = vpop.xlane.xlu0 %1442 }
 0x6c9   :  { %v1452_v8 = vsub.f32 %v1269_v52, %v1443_v11 }
 0x6cb   :  { %v1466_v10 = vmul.f32 1.442695, %v1452_v8 }
 0x6cc   :  { %v1471_v12 = vpop.xlane.xlu0 %1470 }
 0x6cd   :  { %1757 = vpow2.f32 %v1466_v10 }
 0x6ce   :  { %1759 = vlog2.f32 %v1471_v12 }
 0x6d0   :  { %v1475_v14 = vpop.xlane.xlu0 %1474 }
 0x6d1   :  { %1761 = vlog2.f32 %v1475_v14 }
 0x6d4   :  { %v1479_v16 = vpop.xlane.xlu0 %1478 }
 0x6d5   :  { %1763 = vlog2.f32 %v1479_v16 }
 0x6d6   :  { %1765 = vpow2.f32 %v1456_v1 }
 0x6d7   :  { %v1758_v18 = vpop.eup %1757  ;;  %1767 = vpow2.f32 %v1460_v0 }
 0x6d8   :  { %v1760_v20 = vpop.eup %1759  ;;  %1482 = vadd.xlane.f32.xlu0 %v1758_v18  ;;  %1769 = vpow2.f32 %v1464_v19 }
 0x6d9   :  { %v1487_v22 = vmul.f32 0.6931472, %v1760_v20 }
 0x6db   :  { %v1762_v24 = vpop.eup %1761  ;;  %v1502_v26 = vsub.f32 %v1446_v36, %v1487_v22 }
 0x6dc   :  { %v1491_v29 = vmul.f32 0.6931472, %v1762_v24 }
 0x6dd   :  { %1510 = vst [vmem:[%s2243_s5] sm:$0xff] %v1502_v26 }
 0x6de   :  { %v1504_v31 = vsub.f32 %v1448_v41, %v1491_v29 }
 0x6df   :  { %v1764_v33 = vpop.eup %1763 }
 0x6e0   :  { %1512 = vst [vmem:[%s2243_s5 + $0x10] sm:$0xff] %v1504_v31  ;;  %v1495_v58 = vmul.f32 0.6931472, %v1764_v33  ;;  %v1766_v44 = vpop.eup %1765 }
 0x6e1   :  { %v1768_v13 = vpop.eup %1767 }
 0x6e2   :  { %v1506_v59 = vsub.f32 %v1450_v46, %v1495_v58  ;;  %v1770_v45 = vpop.eup %1769 }
 0x6e4   :  { %1514 = vst [vmem:[%s2243_s5 + $0x20] sm:$0xff] %v1506_v59 }
 0x717   :  { %v1404_v17 = vpop.f32.mrb[28].mxu0 }
 0x718   :  { %v1413_v21 = vadd.f32 %v1404_v17, %v238_v5  ;;  %v1406_v27 = vpop.f32.mrb[29].mxu0 }
 0x719   :  { %v1414_v23 = vadd.f32 %v1406_v27, %v240_v7  ;;  %v1408_v25 = vpop.f32.mrb[30].mxu0 }
 0x71a   :  { %v1416_v28 = vpack.c.bf16 %v1413_v21, %v1413_v21  ;;  %1421 = vst [vmem:[%s2244_s6] sm:$0xff] %v1413_v21  ;;  %v1409_v51 = vpop.f32.mrb[31].mxu0 }
 0x71b   :  { %1444 = vmax.xlane.f32.xlu1 %v1414_v23 }
 0x71c   :  { %1417 = vst [vmem:[#allocation3] sm:$0xf] %v1416_v28 }
 0x71f   :  { %1472 = vadd.xlane.f32.xlu1 %v1766_v44 }
 0x723   :  { %1476 = vadd.xlane.f32.xlu1 %v1768_v13 }
 0x727   :  { %1480 = vadd.xlane.f32.xlu1 %v1770_v45 }
 0x765   :  { %v1483_v15 = vpop.xlane.xlu0 %1482 }
 0x766   :  { %1771 = vlog2.f32 %v1483_v15 }
 0x770   :  { %v1772_v56 = vpop.eup %1771 }
 0x771   :  { %v1499_v30 = vmul.f32 0.6931472, %v1772_v56 }
 0x773   :  { %v1508_v32 = vsub.f32 %v1452_v8, %v1499_v30 }
 0x775   :  { %1516 = vst [vmem:[%s2243_s5 + $0x30] sm:$0xff] %v1508_v32 }
 0x7a8   :  { %v1445_v34 = vpop.xlane.xlu1 %1444 }
 0x7a9   :  { %v1453_v35 = vsub.f32 %v1414_v23, %v1445_v34 }
 0x7ab   :  { %v1468_v36 = vmul.f32 1.442695, %v1453_v35 }
 0x7ac   :  { %v1473_v37 = vpop.xlane.xlu1 %1472 }
 0x7ad   :  { %1773 = vpow2.f32 %v1468_v36 }
 0x7ae   :  { %1775 = vlog2.f32 %v1473_v37 }
 0x7b0   :  { %v1477_v38 = vpop.xlane.xlu1 %1476 }
 0x7b1   :  { %1777 = vlog2.f32 %v1477_v38 }
 0x7b4   :  { %v1481_v39 = vpop.xlane.xlu1 %1480 }
 0x7b5   :  { %1779 = vlog2.f32 %v1481_v39 }
 0x7b7   :  { %v1774_v41 = vpop.eup %1773 }
 0x7b8   :  { %v1776_v42 = vpop.eup %1775  ;;  %1484 = vadd.xlane.f32.xlu1 %v1774_v41 }
 0x7b9   :  { %v1489_v43 = vmul.f32 0.6931472, %v1776_v42 }
 0x7bb   :  { %v1778_v46 = vpop.eup %1777  ;;  %v1503_v2 = vsub.f32 %v1447_v60, %v1489_v43 }
 0x7bc   :  { %v1493_v47 = vmul.f32 0.6931472, %v1778_v46 }
 0x7bd   :  { %1511 = vst [vmem:[%s2243_s5 + $0x8] sm:$0xff] %v1503_v2 }
 0x7be   :  { %v1505_v48 = vsub.f32 %v1449_v62, %v1493_v47 }
 0x7bf   :  { %v1780_v49 = vpop.eup %1779 }
 0x7c0   :  { %1513 = vst [vmem:[%s2243_s5 + $0x18] sm:$0xff] %v1505_v48  ;;  %v1497_v57 = vmul.f32 0.6931472, %v1780_v49 }
 0x7c2   :  { %v1507_v50 = vsub.f32 %v1451_v3, %v1497_v57 }
 0x7c4   :  { %1515 = vst [vmem:[%s2243_s5 + $0x28] sm:$0xff] %v1507_v50 }
 0x845   :  { %v1485_v52 = vpop.xlane.xlu1 %1484 }
 0x846   :  { %1781 = vlog2.f32 %v1485_v52 }
 0x850   :  { %v1782_v53 = vpop.eup %1781 }
 0x851   :  { %v1501_v54 = vmul.f32 0.6931472, %v1782_v53 }
 0x853   :  { %v1509_v40 = vsub.f32 %v1453_v35, %v1501_v54 }
 0x855   :  { %1517 = vst [vmem:[%s2243_s5 + $0x38] sm:$0xff] %v1509_v40 }

</bundles_post_ra>
